<compile_context>
chip_gen: v7x
topology: tpu7x:2x2x1
jax: 0.10.0
libtpu: 0.0.40
codegen_flags: <defaults>
</compile_context>

<pallas_src>
import functools

import jax
import jax.numpy as jnp
from jax import lax
from jax.experimental import pallas as pl
from jax.experimental.pallas import tpu as pltpu


def _decoder_kernel(*refs, has_edge: bool, num_students: int, num_items: int):
    if has_edge:
        (idxs_ref, idxi_ref, ef_ref, w1e_ref, hs_ref, item_ref, out_ref) = refs
    else:
        (idxs_ref, idxi_ref, hs_ref, item_ref, out_ref) = refs

    tile_e = out_ref.shape[-1]
    D = hs_ref.shape[0]                      # decoder_channel

    # Per-tile edge indices, shape (1, tile_e) int32.
    ids = idxs_ref[0]
    idi = idxi_ref[0]

    # One-hot selection matrices for the in-kernel gather (MXU-friendly).
    onehot_s = (lax.broadcasted_iota(jnp.int32, (num_students, tile_e), 0)
                == ids).astype(jnp.float32)                     # (Ns, tile_e)
    onehot_i = (lax.broadcasted_iota(jnp.int32, (num_items, tile_e), 0)
                == idi).astype(jnp.float32)                     # (Ni, tile_e)

    # x = ELU( W1_s^T x_student[idx0]^T + W1_e^T edge_feat^T + b1 )
    # Student projection (bias already folded into hs_ref in the wrapper):
    h1 = jnp.dot(hs_ref[...], onehot_s, preferred_element_type=jnp.float32)
    if has_edge:
        h1 = h1 + jnp.dot(w1e_ref[...], ef_ref[...],
                          preferred_element_type=jnp.float32)
    x = jnp.where(h1 > 0.0, h1, jnp.exp(jnp.minimum(h1, 0.0)) - 1.0)

    # Item side: single MXU matmul gives both (W2^T x_item[idx1]^T + b2)
    # (rows 0..D-1, bias folded into the table) and offset[idx1] (row D).
    hi_all = jnp.dot(item_ref[...], onehot_i,
                     preferred_element_type=jnp.float32)        # (D+1, tile_e)
    h2 = hi_all[:D]
    off_g = hi_all[D:]                                          # (1, tile_e)

    # Softplus in PyTorch's threshold-20 form.
    y = jnp.where(h2 > 20.0, h2, jnp.log1p(jnp.exp(jnp.minimum(h2, 20.0))))

    # Channel reduction (sublane reduce) + gathered offset -> lane-dense out.
    s = jnp.sum(x * y, axis=0, keepdims=True)                   # (1, tile_e)
    out_ref[...] = (s + off_g).reshape(1, 1, tile_e)


@functools.partial(jax.jit, static_argnames=("tile_e",))
def classifier_heterogeneous_irt_forward(params, x_student, x_item,
                                         edge_label_index, edge_feat,
                                         offset=None, *, tile_e=512):
    w1, b1, w2, b2 = params      # w1:[Cin+Ce, D], b1:[1,D], w2:[Cin, D], b2:[1,D]
    assert tile_e % 128 == 0

    Ns, Cin = x_student.shape
    Ni = x_item.shape[0]
    D = w1.shape[1]
    has_edge = edge_feat is not None

    idx_s = edge_label_index[0].astype(jnp.int32)
    idx_i = edge_label_index[1].astype(jnp.int32)
    E = idx_s.shape[0]

    # Per-node projections (once per node, not per edge), stored transposed so
    # edges live on the lane axis inside the kernel.  Biases are folded in
    # here (the one-hot gather columns each sum to 1), and the offset is
    # appended as an extra row of the item table so one matmul gathers both
    # the item activations and the offset.
    hs_tab = (x_student.astype(jnp.float32) @ w1[:Cin]).T \
        + b1.reshape(D, 1).astype(jnp.float32)                   # (D, Ns)
    hi_tab = (x_item.astype(jnp.float32) @ w2).T \
        + b2.reshape(D, 1).astype(jnp.float32)                   # (D, Ni)
    off_row = (offset.astype(jnp.float32).reshape(1, Ni)
               if offset is not None else jnp.zeros((1, Ni), jnp.float32))
    item_tab = jnp.concatenate([hi_tab, off_row], axis=0)        # (D+1, Ni)

    num_tiles = (E + tile_e - 1) // tile_e
    E_pad = num_tiles * tile_e
    pad = E_pad - E

    # Only the tiny index vectors (and edge_feat) are padded — no [E, C]
    # gathered/concatenated activations are ever materialized.
    idx_s3 = jnp.pad(idx_s, (0, pad)).reshape(num_tiles, 1, tile_e)
    idx_i3 = jnp.pad(idx_i, (0, pad)).reshape(num_tiles, 1, tile_e)

    inputs = [idx_s3, idx_i3]
    in_specs = [
        pl.BlockSpec((1, 1, tile_e), lambda i: (i, 0, 0)),
        pl.BlockSpec((1, 1, tile_e), lambda i: (i, 0, 0)),
    ]
    if has_edge:
        Ce = edge_feat.shape[1]
        efT = jnp.pad(edge_feat.astype(jnp.float32).T, ((0, 0), (0, pad)))
        w1e_T = w1[Cin:].T.astype(jnp.float32)                  # (D, Ce)
        inputs += [efT, w1e_T]
        in_specs += [
            pl.BlockSpec((Ce, tile_e), lambda i: (0, i)),       # streamed
            pl.BlockSpec((D, Ce), lambda i: (0, 0)),            # resident
        ]
    inputs += [hs_tab, item_tab]
    in_specs += [
        pl.BlockSpec((D, Ns), lambda i: (0, 0)),                # resident
        pl.BlockSpec((D + 1, Ni), lambda i: (0, 0)),            # resident
    ]

    kernel = functools.partial(_decoder_kernel, has_edge=has_edge,
                               num_students=Ns, num_items=Ni)

    out3 = pl.pallas_call(
        kernel,
        out_shape=jax.ShapeDtypeStruct((num_tiles, 1, tile_e), jnp.float32),
        grid_spec=pltpu.PrefetchScalarGridSpec(
            num_scalar_prefetch=0,
            grid=(num_tiles,),
            in_specs=in_specs,
            out_specs=pl.BlockSpec((1, 1, tile_e), lambda i: (i, 0, 0)),
        ),
        compiler_params=pltpu.CompilerParams(
            dimension_semantics=("parallel",)),
    )(*inputs)

    # Lane-dense (num_tiles, 1, tile_e) -> (E, 1)
    return out3.reshape(E_pad, 1)[:E]


def _reference_forward(params, x_student, x_item, edge_label_index,
                       edge_feat, offset):
    """Pure-JAX reference mirroring the PyTorch module."""
    w1, b1, w2, b2 = params
    fs = x_student[edge_label_index[0]]
    fi = x_item[edge_label_index[1]]
    if edge_feat is not None:
        fs = jnp.concatenate([fs, edge_feat], axis=-1)
    x = jax.nn.elu(fs @ w1 + b1)
    y = jax.nn.softplus(fi @ w2 + b2)
    out = jnp.sum(x * y, axis=-1, keepdims=True)
    if offset is not None:
        out = out + offset[edge_label_index[1]]
    return out


def init_params(key, input_channel, edge_dim, decoder_channel):
    """Deterministic Linear-style init (PyTorch kaiming-uniform-ish)."""
    k1, k2, k3, k4 = jax.random.split(key, 4)
    fan1 = input_channel + edge_dim
    fan2 = input_channel
    lim1 = 1.0 / jnp.sqrt(fan1)
    lim2 = 1.0 / jnp.sqrt(fan2)
    # stored as [in, out] (transposed w.r.t. torch's [out, in])
    w1 = jax.random.uniform(k1, (fan1, decoder_channel), jnp.float32, -lim1, lim1)
    b1 = jax.random.uniform(k2, (1, decoder_channel), jnp.float32, -lim1, lim1)
    w2 = jax.random.uniform(k3, (fan2, decoder_channel), jnp.float32, -lim2, lim2)
    b2 = jax.random.uniform(k4, (1, decoder_channel), jnp.float32, -lim2, lim2)
    return (w1, b1, w2, b2)


if __name__ == "__main__":
    key = jax.random.PRNGKey(0)
    k_p, k_s, k_i, k_e, k_o, k_idx0, k_idx1, k_p2 = jax.random.split(key, 8)

    input_channel = 32
    edge_dim = 16
    decoder_channel = 32
    num_students = 64
    num_items = 48
    E = 777  # not a multiple of the tile -> exercises padding; 2-tile grid

    params = init_params(k_p, input_channel, edge_dim, decoder_channel)

    x_student = jax.random.normal(k_s, (num_students, input_channel), jnp.float32)
    x_item = jax.random.normal(k_i, (num_items, input_channel), jnp.float32)
    edge_feat = jax.random.normal(k_e, (E, edge_dim), jnp.float32)
    offset = jax.random.normal(k_o, (num_items, 1), jnp.float32)
    edge_label_index = jnp.stack([
        jax.random.randint(k_idx0, (E,), 0, num_students),
        jax.random.randint(k_idx1, (E,), 0, num_items),
    ]).astype(jnp.int32)

    # Full path: edge features + offset.
    out = classifier_heterogeneous_irt_forward(
        params, x_student, x_item, edge_label_index, edge_feat, offset)
    out = jax.block_until_ready(out)
    ref = _reference_forward(params, x_student, x_item, edge_label_index,
                             edge_feat, offset)
    assert out.shape == (E, 1)
    assert jnp.allclose(out, ref, atol=1e-3, rtol=1e-3), "mismatch (edge+offset)"

    # Second path: no edge features, no offset (edge_dim = 0 module config).
    params2 = init_params(k_p2, input_channel, 0, decoder_channel)
    out2 = classifier_heterogeneous_irt_forward(
        params2, x_student, x_item, edge_label_index, None, None)
    out2 = jax.block_until_ready(out2)
    ref2 = _reference_forward(params2, x_student, x_item, edge_label_index,
                              None, None)
    assert out2.shape == (E, 1)
    assert jnp.allclose(out2, ref2, atol=1e-3, rtol=1e-3), "mismatch (no edge)"

    print("KERNEL_OK")
</pallas_src>

<mosaic_0001>
module attributes {stable_mosaic.version = 11 : i64} {
  func.func @_decoder_kernel(%arg0: i32, %arg1: memref<1x1x512xi32, #tpu.memory_space<vmem>>, %arg2: memref<1x1x512xi32, #tpu.memory_space<vmem>>, %arg3: memref<16x512xf32, #tpu.memory_space<vmem>>, %arg4: memref<32x16xf32, #tpu.memory_space<vmem>>, %arg5: memref<32x64xf32, #tpu.memory_space<vmem>>, %arg6: memref<33x48xf32, #tpu.memory_space<vmem>>, %arg7: memref<1x1x512xf32, #tpu.memory_space<vmem>>) attributes {dimension_semantics = [#tpu.dimension_semantics<parallel>], iteration_bounds = array<i64: 2>, scalar_prefetch = 0 : i64, scratch_operands = 0 : i64, tpu.core_type = #tpu.core_type<tc>, window_params = [{transform_indices = @transform_0, window_bounds = array<i64: 1, 1, 512>}, {transform_indices = @transform_1, window_bounds = array<i64: 1, 1, 512>}, {transform_indices = @transform_2, window_bounds = array<i64: 16, 512>}, {pipeline_mode = #tpu.pipeline_mode<synchronous>, transform_indices = @transform_3, window_bounds = array<i64: 32, 16>}, {pipeline_mode = #tpu.pipeline_mode<synchronous>, transform_indices = @transform_4, window_bounds = array<i64: 32, 64>}, {pipeline_mode = #tpu.pipeline_mode<synchronous>, transform_indices = @transform_5, window_bounds = array<i64: 33, 48>}, {transform_indices = @transform_6, window_bounds = array<i64: 1, 1, 512>}]} {
    %c0 = arith.constant 0 : index
    %c0_0 = arith.constant 0 : index
    %c0_1 = arith.constant 0 : index
    %0 = vector.load %arg1[%c0, %c0_0, %c0_1] : memref<1x1x512xi32, #tpu.memory_space<vmem>>, vector<1x1x512xi32>
    %1 = vector.shape_cast %0 : vector<1x1x512xi32> to vector<1x512xi32>
    %c0_2 = arith.constant 0 : index
    %c0_3 = arith.constant 0 : index
    %c0_4 = arith.constant 0 : index
    %2 = vector.load %arg2[%c0_2, %c0_3, %c0_4] : memref<1x1x512xi32, #tpu.memory_space<vmem>>, vector<1x1x512xi32>
    %3 = vector.shape_cast %2 : vector<1x1x512xi32> to vector<1x512xi32>
    %4 = tpu.iota {dimensions = array<i32: 0>} : vector<64x512xi32>
    %5 = vector.broadcast %1 : vector<1x512xi32> to vector<64x512xi32>
    %6 = arith.cmpi eq, %4, %5 : vector<64x512xi32>
    %7 = arith.extui %6 : vector<64x512xi1> to vector<64x512xi32>
    %8 = arith.sitofp %7 : vector<64x512xi32> to vector<64x512xf32>
    %9 = tpu.iota {dimensions = array<i32: 0>} : vector<48x512xi32>
    %10 = vector.broadcast %3 : vector<1x512xi32> to vector<48x512xi32>
    %11 = arith.cmpi eq, %9, %10 : vector<48x512xi32>
    %12 = arith.extui %11 : vector<48x512xi1> to vector<48x512xi32>
    %13 = arith.sitofp %12 : vector<48x512xi32> to vector<48x512xf32>
    %c0_5 = arith.constant 0 : index
    %c0_6 = arith.constant 0 : index
    %14 = vector.load %arg5[%c0_5, %c0_6] : memref<32x64xf32, #tpu.memory_space<vmem>>, vector<32x64xf32>
    %cst = arith.constant dense<0.000000e+00> : vector<32x512xf32>
    %15 = tpu.matmul %14, %8, %cst {dimension_numbers = #tpu.dot_dimension_numbers<[1], [0], [0], [1], [0, 0, 1, 1], [], []>} : vector<32x64xf32>, vector<64x512xf32>, vector<32x512xf32> -> vector<32x512xf32>
    %c0_7 = arith.constant 0 : index
    %c0_8 = arith.constant 0 : index
    %16 = vector.load %arg4[%c0_7, %c0_8] : memref<32x16xf32, #tpu.memory_space<vmem>>, vector<32x16xf32>
    %c0_9 = arith.constant 0 : index
    %c0_10 = arith.constant 0 : index
    %17 = vector.load %arg3[%c0_9, %c0_10] : memref<16x512xf32, #tpu.memory_space<vmem>>, vector<16x512xf32>
    %cst_11 = arith.constant dense<0.000000e+00> : vector<32x512xf32>
    %18 = tpu.matmul %16, %17, %cst_11 {dimension_numbers = #tpu.dot_dimension_numbers<[1], [0], [0], [1], [0, 0, 1, 1], [], []>} : vector<32x16xf32>, vector<16x512xf32>, vector<32x512xf32> -> vector<32x512xf32>
    %19 = arith.addf %15, %18 : vector<32x512xf32>
    %cst_12 = arith.constant 0.000000e+00 : f32
    %20 = vector.broadcast %cst_12 : f32 to vector<32x512xf32>
    %21 = arith.cmpf ogt, %19, %20 : vector<32x512xf32>
    %cst_13 = arith.constant 0.000000e+00 : f32
    %22 = vector.broadcast %cst_13 : f32 to vector<32x512xf32>
    %23 = arith.minimumf %19, %22 : vector<32x512xf32>
    %24 = math.exp %23 : vector<32x512xf32>
    %cst_14 = arith.constant 1.000000e+00 : f32
    %25 = vector.broadcast %cst_14 : f32 to vector<32x512xf32>
    %26 = arith.subf %24, %25 : vector<32x512xf32>
    %27 = arith.select %21, %19, %26 : vector<32x512xi1>, vector<32x512xf32>
    %c0_15 = arith.constant 0 : index
    %c0_16 = arith.constant 0 : index
    %28 = vector.load %arg6[%c0_15, %c0_16] : memref<33x48xf32, #tpu.memory_space<vmem>>, vector<33x48xf32>
    %cst_17 = arith.constant dense<0.000000e+00> : vector<33x512xf32>
    %29 = tpu.matmul %28, %13, %cst_17 {dimension_numbers = #tpu.dot_dimension_numbers<[1], [0], [0], [1], [0, 0, 1, 1], [], []>} : vector<33x48xf32>, vector<48x512xf32>, vector<33x512xf32> -> vector<33x512xf32>
    %30 = vector.extract_strided_slice %29 {offsets = [0, 0], sizes = [32, 512], strides = [1, 1]} : vector<33x512xf32> to vector<32x512xf32>
    %31 = vector.extract_strided_slice %29 {offsets = [32, 0], sizes = [1, 512], strides = [1, 1]} : vector<33x512xf32> to vector<1x512xf32>
    %cst_18 = arith.constant 2.000000e+01 : f32
    %32 = vector.broadcast %cst_18 : f32 to vector<32x512xf32>
    %33 = arith.cmpf ogt, %30, %32 : vector<32x512xf32>
    %cst_19 = arith.constant 2.000000e+01 : f32
    %34 = vector.broadcast %cst_19 : f32 to vector<32x512xf32>
    %35 = arith.minimumf %30, %34 : vector<32x512xf32>
    %36 = math.exp %35 : vector<32x512xf32>
    %37 = math.log1p %36 : vector<32x512xf32>
    %38 = arith.select %33, %30, %37 : vector<32x512xi1>, vector<32x512xf32>
    %39 = arith.mulf %27, %38 : vector<32x512xf32>
    %cst_20 = arith.constant dense<0.000000e+00> : vector<512xf32>
    %40 = vector.multi_reduction <add>, %39, %cst_20 [0] : vector<32x512xf32> to vector<512xf32>
    %41 = vector.shape_cast %40 : vector<512xf32> to vector<1x512xf32>
    %42 = arith.addf %41, %31 : vector<1x512xf32>
    %43 = vector.shape_cast %42 : vector<1x512xf32> to vector<1x1x512xf32>
    %c0_21 = arith.constant 0 : index
    %c0_22 = arith.constant 0 : index
    %c0_23 = arith.constant 0 : index
    %44 = vector.load %arg7[%c0_21, %c0_22, %c0_23] : memref<1x1x512xf32, #tpu.memory_space<vmem>>, vector<1x1x512xf32>
    tpu.vector_store %arg7[%c0_21, %c0_22, %c0_23], %43 {strides = array<i32>} : memref<1x1x512xf32, #tpu.memory_space<vmem>>, vector<1x1x512xf32>,
    return
  }
  func.func @transform_0(%arg0: i32) -> (i32, i32, i32) {
    %c0_i32 = arith.constant 0 : i32
    %c0_i32_0 = arith.constant 0 : i32
    %c0_i32_1 = arith.constant 0 : i32
    return %arg0, %c0_i32, %c0_i32_0 : i32, i32, i32
  }
  func.func @transform_1(%arg0: i32) -> (i32, i32, i32) {
    %c0_i32 = arith.constant 0 : i32
    %c0_i32_0 = arith.constant 0 : i32
    %c0_i32_1 = arith.constant 0 : i32
    return %arg0, %c0_i32, %c0_i32_0 : i32, i32, i32
  }
  func.func @transform_2(%arg0: i32) -> (i32, i32) {
    %c0_i32 = arith.constant 0 : i32
    %c0_i32_0 = arith.constant 0 : i32
    return %c0_i32, %arg0 : i32, i32
  }
  func.func @transform_3(%arg0: i32) -> (i32, i32) {
    %c0_i32 = arith.constant 0 : i32
    %c0_i32_0 = arith.constant 0 : i32
    %c0_i32_1 = arith.constant 0 : i32
    return %c0_i32, %c0_i32_0 : i32, i32
  }
  func.func @transform_4(%arg0: i32) -> (i32, i32) {
    %c0_i32 = arith.constant 0 : i32
    %c0_i32_0 = arith.constant 0 : i32
    %c0_i32_1 = arith.constant 0 : i32
    return %c0_i32, %c0_i32_0 : i32, i32
  }
  func.func @transform_5(%arg0: i32) -> (i32, i32) {
    %c0_i32 = arith.constant 0 : i32
    %c0_i32_0 = arith.constant 0 : i32
    %c0_i32_1 = arith.constant 0 : i32
    return %c0_i32, %c0_i32_0 : i32, i32
  }
  func.func @transform_6(%arg0: i32) -> (i32, i32, i32) {
    %c0_i32 = arith.constant 0 : i32
    %c0_i32_0 = arith.constant 0 : i32
    %c0_i32_1 = arith.constant 0 : i32
    return %arg0, %c0_i32, %c0_i32_0 : i32, i32, i32
  }
}

</mosaic_0001>

<bundles_post_ra>
// kernel: classifier_heterogeneous_irt_forward.1
= control target key start
LH: loop header
LB: loop body
LE: loop exit
PB: predicated region body
PF: predicated region fallthrough
CT: control target
= control target key end

     0   :  { %s2066_s21 = smov 0   ;;  %s2068_s22 = smov 0   ;;  %s2844_s0 = inlined_call_operand.vmem [shape: s32[2,1,512], index: 0, kind: input, shape index: {}]   ;;  %s2845_s1 = inlined_call_operand.vmem [shape: s32[2,1,512], index: 1, kind: input, shape index: {}]   ;;  %s2846_s2 = inlined_call_operand.vmem [shape: f32[16,1024], index: 2, kind: input, shape index: {}]   ;;  %s2847_s3 = inlined_call_operand.vmem [shape: f32[32,16], index: 3, kind: input, shape index: {}]   ;;  %s2848_s4 = inlined_call_operand.vmem [shape: f32[32,64], index: 4, kind: input, shape index: {}]   ;;  %s2849_s5 = inlined_call_operand.vmem [shape: f32[33,48], index: 5, kind: input, shape index: {}]   ;;  %s2850_s6 = inlined_call_operand.vmem [shape: f32[2,1,512], index: 6, kind: output, shape index: {}]  }
   0x1   :  { %s2070_s23 = smov 0  }
   0x2 LB: > { %s1632_s24 = sadd.s32 4294967295, %s2026_s23   ;;  %s2083_s25 = sadd.s32 1, %s2026_s23   ;;  %s2026_s23 = sphi %s2070_s23, %s2909_s23   ;;  %s2022_s22 = sphi %s2068_s22, %s2908_s22   ;;  %s2018_s21 = sphi %s2066_s21, %s2907_s21  }
   0x3   : > { %s72_s26 = ssub.s32 %s2026_s23, %s2083_s25  ;;  %s75_s27 = sadd.s32 1, %s2022_s22 }
   0x4   : > { %p73_p0 = scmp.eq.s32.totalorder %s72_s26, 0  ;;  %p82_p1 = scmp.ne.s32.totalorder %s2022_s22, %s2018_s21 }
   0x5   : > { %p83_p2 = scmp.eq.s32.totalorder %s2026_s23, 0  ;;  %p1635_p4 = scmp.ge.s32.totalorder %s2026_s23, 2 }
   0x6   : > { %s2092_s28 = scalar_select %p73_p0, %s2022_s22, %s75_s27  }
   0x7   : > { %p84_p3 = por %p83_p2, %p82_p1  ;;  %206 = sbr.rel (%p1635_p4) target bundleno = 22 (0x16), region = 28 }
   0xe   : > { %223 = sbr.rel (!%p84_p3) target bundleno = 22 (0x16), region = 40  ;;  %s225_s29 = sand.u32 (%p84_p3), 1, %s2022_s22  }
   0xf   : > { %s1800_s30 = sshll.u32 (%p84_p3), %s2026_s23, 5  ;;  %s1636_s7 = sshll.u32 (%p84_p3), %s225_s29, 6 }
  0x10   : > { %s230_s10 = scalar_lea.vmem (%p84_p3), %s2846_s2, %s1800_s30  ;;  %s227_s11 = scalar_lea.vmem (%p84_p3), [#allocation2], %s1636_s7 }
  0x11   : > { %v243_v0 = vld [vmem:[%s230_s10] sm:$0xff] (%p84_p3)  ;;  %v245_v1 = vld [vmem:[%s230_s10 + $0x8] sm:$0xff] (%p84_p3)  ;;  %v247_v2 = vld [vmem:[%s230_s10 + $0x10] sm:$0xff] (%p84_p3) }
  0x12   : > { %244 = vst [vmem:[%s227_s11] sm:$0xff] (%p84_p3), %v243_v0  ;;  %246 = vst [vmem:[%s227_s11 + $0x8] sm:$0xff] (%p84_p3), %v245_v1  ;;  %v249_v3 = vld [vmem:[%s230_s10 + $0x18] sm:$0xff] (%p84_p3)  ;;  %v251_v4 = vld [vmem:[%s230_s10 + $0x40] sm:$0xff] (%p84_p3) }
  0x13   : > { %248 = vst [vmem:[%s227_s11 + $0x10] sm:$0xff] (%p84_p3), %v247_v2  ;;  %v253_v5 = vld [vmem:[%s230_s10 + $0x48] sm:$0xff] (%p84_p3)  ;;  %250 = vst [vmem:[%s227_s11 + $0x18] sm:$0xff] (%p84_p3), %v249_v3  ;;  %v255_v6 = vld [vmem:[%s230_s10 + $0x50] sm:$0xff] (%p84_p3) }
  0x14   : > { %252 = vst [vmem:[%s227_s11 + $0x20] sm:$0xff] (%p84_p3), %v251_v4  ;;  %254 = vst [vmem:[%s227_s11 + $0x28] sm:$0xff] (%p84_p3), %v253_v5  ;;  %v257_v7 = vld [vmem:[%s230_s10 + $0x58] sm:$0xff] (%p84_p3) }
  0x15   : > { %256 = vst [vmem:[%s227_s11 + $0x30] sm:$0xff] %v255_v6  ;;  %258 = vst [vmem:[%s227_s11 + $0x38] sm:$0xff] %v257_v7 }
  0x16 PF: > { %p1639_p5 = scmp.ge.s32.totalorder %s2026_s23, 1  ;;  %p263_p6 = scmp.lt.s32.totalorder %s2026_s23, 3 }
  0x18   : > { %p264_p7 = pnand %p1639_p5, %p263_p6 }
  0x1a   : > { %267 = sbr.rel (%p264_p7) target bundleno = 401 (0x191), region = 63 }
  0x21   : > { %s270_s12 = sand.u32 1, %s2018_s21   ;;  %p306_p8 = scmp.lt.s32.totalorder %s1632_s24, 1  ;;  %v2851_v8 = vlaneseq  ;;  %v2028_v9 = vmov 0.0   ;;  %v534_v28 = vld [vmem:[%s2847_s3] sm:$0xff]  ;;  %vm546_vm0 = vcmask 130048   ;;  %v535_v37 = vld [vmem:[%s2847_s3 + $0x8] sm:$0xff] }
  0x22   : > { %s1640_s13 = sshll.u32 %s270_s12, 6  ;;  %623 = vmatprep.mubr.f32.mxu0 %v2028_v9  ;;  %712 = vmatprep.mubr.f32.mxu1 %v2028_v9  ;;  %v2029_v36 = vmov 1.0|1.0   ;;  %v536_v40 = vld [vmem:[%s2847_s3 + $0x10] sm:$0xff]  ;;  %v537_v44 = vld [vmem:[%s2847_s3 + $0x18] sm:$0xff]  ;;  %v530_v49 = vld [vmem:[%s2848_s4] sm:$0xff] }
  0x23   : > { %v2108_v10 = vshrl.u32 %v2851_v8, 7  ;;  %s272_s14 = scalar_lea.vmem [#allocation2], %s1640_s13  ;;  %s2911_s24 = smov (!%p306_p8, %s1632_s24), 1  ;;  %v531_v50 = vld [vmem:[%s2848_s4 + $0x8] sm:$0xff]  ;;  %v532_v51 = vld [vmem:[%s2848_s4 + $0x10] sm:$0xff]  ;;  %v533_v52 = vld [vmem:[%s2848_s4 + $0x18] sm:$0xff] }
  0x24   : > { %v539_v11 = vld [vmem:[%s272_s14 + $0x8] sm:$0xff]  ;;  %v541_v13 = vld [vmem:[%s272_s14 + $0x18] sm:$0xff]  ;;  %v538_v16 = vld [vmem:[%s272_s14] sm:$0xff]  ;;  %s2114_s15 = sshll.u32 %s2911_s24, 2 }
  0x25   : > { %2863 = vst [vmem:[#allocation3_spill] sm:$0xff] %v2108_v10  ;;  %v543_v12 = vld [vmem:[%s272_s14 + $0x28] sm:$0xff]  ;;  %v545_v15 = vld [vmem:[%s272_s14 + $0x38] sm:$0xff]  ;;  %v542_v17 = vld [vmem:[%s272_s14 + $0x20] sm:$0xff]  ;;  %v336_v18 = vsub.s32 1, %v2108_v10  ;;  %v344_v19 = vsub.s32 3, %v2108_v10  ;;  %s309_s18 = scalar_lea.vmem %s2844_s0, %s2114_s15  ;;  %s313_s27 = scalar_lea.vmem %s2845_s1, %s2114_s15 }
  0x26   : > { %v1801_v14 = vpack.c.bf16 %v543_v12, %v539_v11  ;;  %v1805_v20 = vpack.c.bf16 %v545_v15, %v541_v13  ;;  %v1803_v21 = vpack.c.bf16 %v542_v17, %v538_v16  ;;  %v540_v22 = vld [vmem:[%s272_s14 + $0x10] sm:$0xff]  ;;  %v332_v24 = vsub.s32 0, %v2108_v10  ;;  %v319_v29 = vld [vmem:[%s309_s18] sm:$0xf]  ;;  %v1025_v54 = vld [vmem:[%s2849_s5 + $0x8] sm:$0xff]  ;;  %s318_s9 = scalar_lea.vmem %s2850_s6, %s2114_s15 }
  0x27   : > { %v544_v23 = vld [vmem:[%s272_s14 + $0x30] sm:$0xff]  ;;  %v340_v25 = vsub.s32 2, %v2108_v10  ;;  %v2123_v27 = vadd.s32 8, %v2108_v10  ;;  %v2129_v30 = vadd.s32 16, %v2108_v10  ;;  %v2132_v31 = vadd.s32 24, %v2108_v10  ;;  %v1024_v53 = vld [vmem:[%s2849_s5] sm:$0xff] }
  0x28   : > { %1802 = vmatprep.subr.bf16.mxu0 %v1801_v14  ;;  %v1807_v26 = vpack.c.bf16 %v544_v23, %v540_v22  ;;  %1806 = vmatprep.subr.bf16.mxu1 %v1805_v20  ;;  %v2136_v32 = vrot.slane %v319_v29, %v336_v18  ;;  %v2140_v33 = vrot.slane %v319_v29, %v344_v19  ;;  %v2178_v38 = vadd.s32 32, %v2108_v10  ;;  %v320_v43 = vld [vmem:[%s313_s27] sm:$0xf]  ;;  %v1026_v55 = vld [vmem:[%s2849_s5 + $0x10] sm:$0xff]  ;;  %v1027_v56 = vld [vmem:[%s2849_s5 + $0x18] sm:$0xff] }
  0x29   : > { %1804 = vmatpush1.bf16.msra.mxu0 %v1803_v21  ;;  %v2144_v34 = vrot.slane %v319_v29, %v332_v24  ;;  %v2148_v35 = vrot.slane %v319_v29, %v340_v25  ;;  %v2181_v39 = vadd.s32 40, %v2108_v10  ;;  %v328_v41 = vadd.s32 48, %v2108_v10  ;;  %v1028_v57 = vld [vmem:[%s2849_s5 + $0x20] sm:$0x1] }
  0x2a   : > { %1808 = vmatpush1.bf16.msra.mxu1 %v1807_v26  ;;  %vm347_vm1 = vcmp.eq.s32.totalorder %v2108_v10, %v2136_v32  ;;  %vm351_vm2 = vcmp.eq.s32.totalorder %v2123_v27, %v2136_v32  ;;  %vm349_vm3 = vcmp.eq.s32.totalorder %v2108_v10, %v2140_v33  ;;  %vm353_vm4 = vcmp.eq.s32.totalorder %v2123_v27, %v2140_v33 }
  0x2b   : > { %vm1809_vm5 = vmpackc.low %vm351_vm2, %vm347_vm1  ;;  %vm346_vm6 = vcmp.eq.s32.totalorder %v2108_v10, %v2144_v34  ;;  %vm350_vm7 = vcmp.eq.s32.totalorder %v2123_v27, %v2144_v34  ;;  %vm348_vm8 = vcmp.eq.s32.totalorder %v2108_v10, %v2148_v35  ;;  %vm352_vm9 = vcmp.eq.s32.totalorder %v2123_v27, %v2148_v35 }
  0x2c   : > { %1700 = vmatmul.mubr.msk.f32.vlgmr.msra.gmra.mrb[0].mxu0 %vm546_vm0, %v534_v28  ;;  %1810 = vmatprep.subr.msk.bf16.mxu0 %vm1809_vm5, %v2029_v36  ;;  %vm1825_vm10 = vmpackc.low %vm353_vm4, %vm349_vm3  ;;  %vm355_vm11 = vcmp.eq.s32.totalorder %v2129_v30, %v2136_v32  ;;  %vm359_vm12 = vcmp.eq.s32.totalorder %v2132_v31, %v2136_v32  ;;  %vm357_vm14 = vcmp.eq.s32.totalorder %v2129_v30, %v2140_v33  ;;  %v329_v42 = vadd.s32 56, %v2108_v10 }
  0x2d   : > { %1704 = vmatmul.mubr.msk.f32.vlgmr.msra.gmra.mrb[0].mxu1 %vm546_vm0, %v534_v28  ;;  %629 = vmatprep.mubr.f32.mxu0 %v2028_v9  ;;  %vm1811_vm13 = vmpackc.low %vm350_vm7, %vm346_vm6  ;;  %vm361_vm15 = vcmp.eq.s32.totalorder %v2132_v31, %v2140_v33  ;;  %vm354_vm2 = vcmp.eq.s32.totalorder %v2129_v30, %v2144_v34  ;;  %vm358_vm3 = vcmp.eq.s32.totalorder %v2132_v31, %v2144_v34 }
  0x2e   : > { %1826 = vmatprep.subr.msk.bf16.mxu1 %vm1825_vm10, %v2029_v36  ;;  %718 = vmatprep.mubr.f32.mxu1 %v2028_v9  ;;  %vm1827_vm1 = vmpackc.low %vm352_vm9, %vm348_vm8  ;;  %vm356_vm5 = vcmp.eq.s32.totalorder %v2129_v30, %v2148_v35  ;;  %vm360_vm6 = vcmp.eq.s32.totalorder %v2132_v31, %v2148_v35  ;;  %vm363_vm8 = vcmp.eq.s32.totalorder %v2178_v38, %v2136_v32 }
  0x2f   : > { %1812 = vmatpush1.bf16.msk.msra.mxu0 %vm1811_vm13, %v2029_v36  ;;  %1828 = vmatpush1.bf16.msk.msra.mxu1 %vm1827_vm1, %v2029_v36  ;;  %vm1813_vm4 = vmpackc.low %vm359_vm12, %vm355_vm11  ;;  %vm367_vm9 = vcmp.eq.s32.totalorder %v2181_v39, %v2136_v32  ;;  %vm365_vm11 = vcmp.eq.s32.totalorder %v2178_v38, %v2140_v33  ;;  %vm369_vm12 = vcmp.eq.s32.totalorder %v2181_v39, %v2140_v33 }
  0x30   : > { %1701 = vmatmul.mubr.msk.f32.gmra.mrb[2].mxu0 %vm546_vm0, %v535_v37  ;;  %1814 = vmatprep.subr.msk.bf16.mxu0 %vm1813_vm4, %v2029_v36  ;;  %vm1829_vm7 = vmpackc.low %vm361_vm15, %vm357_vm14  ;;  %vm362_vm14 = vcmp.eq.s32.totalorder %v2178_v38, %v2144_v34  ;;  %vm366_vm15 = vcmp.eq.s32.totalorder %v2181_v39, %v2144_v34  ;;  %v2275_v45 = vrot.slane %v320_v43, %v336_v18 }
  0x31   : > { %1705 = vmatmul.mubr.msk.f32.gmra.mrb[2].mxu1 %vm546_vm0, %v535_v37  ;;  %1830 = vmatprep.subr.msk.bf16.mxu1 %vm1829_vm7, %v2029_v36  ;;  %vm1815_vm10 = vmpackc.low %vm358_vm3, %vm354_vm2  ;;  %vm364_vm2 = vcmp.eq.s32.totalorder %v2178_v38, %v2148_v35  ;;  %vm368_vm3 = vcmp.eq.s32.totalorder %v2181_v39, %v2148_v35  ;;  %v2286_v46 = vrot.slane %v320_v43, %v344_v19 }
  0x32   : > { %635 = vmatprep.mubr.f32.mxu0 %v2028_v9  ;;  %vm1831_vm13 = vmpackc.low %vm360_vm6, %vm356_vm5  ;;  %724 = vmatprep.mubr.f32.mxu1 %v2028_v9  ;;  %vm371_vm5 = vcmp.eq.s32.totalorder %v328_v41, %v2136_v32  ;;  %vm375_vm6 = vcmp.eq.s32.totalorder %v329_v42, %v2136_v32  ;;  %v2300_v47 = vrot.slane %v320_v43, %v332_v24 }
  0x33   : > { %1816 = vmatpush1.bf16.msk.msra.mxu0 %vm1815_vm10, %v2029_v36  ;;  %1832 = vmatpush1.bf16.msk.msra.mxu1 %vm1831_vm13, %v2029_v36  ;;  %vm1817_vm1 = vmpackc.low %vm367_vm9, %vm363_vm8  ;;  %vm373_vm8 = vcmp.eq.s32.totalorder %v328_v41, %v2140_v33  ;;  %vm377_vm9 = vcmp.eq.s32.totalorder %v329_v42, %v2140_v33  ;;  %v2312_v48 = vrot.slane %v320_v43, %v340_v25 }
  0x34   : > { %1702 = vmatmul.mubr.msk.f32.gmra.mrb[4].mxu0 %vm546_vm0, %v536_v40  ;;  %1818 = vmatprep.subr.msk.bf16.mxu0 %vm1817_vm1, %v2029_v36  ;;  %vm1833_vm4 = vmpackc.low %vm369_vm12, %vm365_vm11  ;;  %vm370_vm11 = vcmp.eq.s32.totalorder %v328_v41, %v2144_v34  ;;  %vm374_vm12 = vcmp.eq.s32.totalorder %v329_v42, %v2144_v34 }
  0x35   : > { %1706 = vmatmul.mubr.msk.f32.gmra.mrb[4].mxu1 %vm546_vm0, %v536_v40  ;;  %1834 = vmatprep.subr.msk.bf16.mxu1 %vm1833_vm4, %v2029_v36  ;;  %vm1819_vm7 = vmpackc.low %vm366_vm15, %vm362_vm14  ;;  %vm372_vm14 = vcmp.eq.s32.totalorder %v328_v41, %v2148_v35  ;;  %vm376_vm15 = vcmp.eq.s32.totalorder %v329_v42, %v2148_v35 }
  0x36   : > { %641 = vmatprep.mubr.f32.mxu0 %v2028_v9  ;;  %vm1835_vm10 = vmpackc.low %vm368_vm3, %vm364_vm2  ;;  %730 = vmatprep.mubr.f32.mxu1 %v2028_v9  ;;  %vm459_vm2 = vcmp.eq.s32.totalorder %v2108_v10, %v2275_v45  ;;  %vm463_vm3 = vcmp.eq.s32.totalorder %v2123_v27, %v2275_v45 }
  0x37   : > { %1820 = vmatpush1.bf16.msk.msra.mxu0 %vm1819_vm7, %v2029_v36  ;;  %1836 = vmatpush1.bf16.msk.msra.mxu1 %vm1835_vm10, %v2029_v36  ;;  %vm1821_vm13 = vmpackc.low %vm375_vm6, %vm371_vm5  ;;  %vm465_vm5 = vcmp.eq.s32.totalorder %v2123_v27, %v2286_v46  ;;  %vm737_vm7 = vcmask 523264  }
  0x38   : > { %1703 = vmatmul.mubr.msk.f32.gmra.mrb[6].mxu0 %vm546_vm0, %v537_v44  ;;  %1822 = vmatprep.subr.msk.bf16.mxu0 %vm1821_vm13, %v2029_v36  ;;  %vm1837_vm1 = vmpackc.low %vm377_vm9, %vm373_vm8  ;;  %vm458_vm8 = vcmp.eq.s32.totalorder %v2108_v10, %v2300_v47  ;;  %vm462_vm9 = vcmp.eq.s32.totalorder %v2123_v27, %v2300_v47 }
  0x39   : > { %1707 = vmatmul.mubr.msk.f32.gmra.mrb[6].mxu1 %vm546_vm0, %v537_v44  ;;  %1838 = vmatprep.subr.msk.bf16.mxu1 %vm1837_vm1, %v2029_v36  ;;  %vm1823_vm4 = vmpackc.low %vm374_vm12, %vm370_vm11  ;;  %vm461_vm0 = vcmp.eq.s32.totalorder %v2108_v10, %v2286_v46  ;;  %vm460_vm11 = vcmp.eq.s32.totalorder %v2108_v10, %v2312_v48  ;;  %vm464_vm12 = vcmp.eq.s32.totalorder %v2123_v27, %v2312_v48 }
  0x3a   : > { %814 = vmatprep.mubr.f32.mxu0 %v2028_v9  ;;  %vm1839_vm6 = vmpackc.low %vm376_vm15, %vm372_vm14  ;;  %903 = vmatprep.mubr.f32.mxu1 %v2028_v9  ;;  %vm467_vm14 = vcmp.eq.s32.totalorder %v2129_v30, %v2275_v45  ;;  %vm471_vm15 = vcmp.eq.s32.totalorder %v2132_v31, %v2275_v45 }
  0x3b   : > { %1824 = vmatpush1.bf16.msk.msra.mxu0 %vm1823_vm4, %v2029_v36  ;;  %1840 = vmatpush1.bf16.msk.msra.mxu1 %vm1839_vm6, %v2029_v36  ;;  %vm1841_vm10 = vmpackc.low %vm463_vm3, %vm459_vm2  ;;  %vm469_vm2 = vcmp.eq.s32.totalorder %v2129_v30, %v2286_v46  ;;  %vm473_vm3 = vcmp.eq.s32.totalorder %v2132_v31, %v2286_v46 }
  0x3c   : > { %1842 = vmatprep.subr.msk.bf16.mxu0 %vm1841_vm10, %v2029_v36  ;;  %vm1853_vm13 = vmpackc.low %vm465_vm5, %vm461_vm0  ;;  %vm466_vm0 = vcmp.eq.s32.totalorder %v2129_v30, %v2300_v47  ;;  %vm470_vm5 = vcmp.eq.s32.totalorder %v2132_v31, %v2300_v47 }
  0x3d   : > { %1854 = vmatprep.subr.msk.bf16.mxu1 %vm1853_vm13, %v2029_v36  ;;  %vm1843_vm1 = vmpackc.low %vm462_vm9, %vm458_vm8  ;;  %vm468_vm8 = vcmp.eq.s32.totalorder %v2129_v30, %v2312_v48  ;;  %vm472_vm9 = vcmp.eq.s32.totalorder %v2132_v31, %v2312_v48 }
  0x3e   : > { %1724 = vmatmul.mubr.msk.f32.vlgmr.msra.gmra.mrb[0].mxu0 %vm737_vm7, %v530_v49  ;;  %1744 = vmatmul.mubr.msk.f32.vlgmr.msra.gmra.mrb[0].mxu1 %vm737_vm7, %v530_v49  ;;  %vm1855_vm4 = vmpackc.low %vm464_vm12, %vm460_vm11  ;;  %vm475_vm11 = vcmp.eq.s32.totalorder %v2178_v38, %v2275_v45  ;;  %vm479_vm12 = vcmp.eq.s32.totalorder %v2181_v39, %v2275_v45 }
  0x3f   : > { %1844 = vmatpush1.bf16.msk.msra.mxu0 %vm1843_vm1, %v2029_v36  ;;  %1856 = vmatpush1.bf16.msk.msra.mxu1 %vm1855_vm4, %v2029_v36  ;;  %vm1845_vm6 = vmpackc.low %vm471_vm15, %vm467_vm14  ;;  %vm477_vm14 = vcmp.eq.s32.totalorder %v2178_v38, %v2286_v46  ;;  %vm481_vm15 = vcmp.eq.s32.totalorder %v2181_v39, %v2286_v46 }
  0x40   : > { %820 = vmatprep.mubr.f32.mxu0 %v2028_v9  ;;  %909 = vmatprep.mubr.f32.mxu1 %v2028_v9  ;;  %vm1857_vm10 = vmpackc.low %vm473_vm3, %vm469_vm2  ;;  %vm474_vm2 = vcmp.eq.s32.totalorder %v2178_v38, %v2300_v47  ;;  %vm478_vm3 = vcmp.eq.s32.totalorder %v2181_v39, %v2300_v47 }
  0x41   : > { %1846 = vmatprep.subr.msk.bf16.mxu0 %vm1845_vm6, %v2029_v36  ;;  %1858 = vmatprep.subr.msk.bf16.mxu1 %vm1857_vm10, %v2029_v36  ;;  %vm1847_vm13 = vmpackc.low %vm470_vm5, %vm466_vm0  ;;  %vm476_vm0 = vcmp.eq.s32.totalorder %v2178_v38, %v2312_v48  ;;  %vm480_vm5 = vcmp.eq.s32.totalorder %v2181_v39, %v2312_v48  ;;  %vm1029_vm10 = vcmask 392192  }
  0x42   : > { %1725 = vmatmul.mubr.msk.f32.gmra.mrb[2].mxu0 %vm737_vm7, %v531_v50  ;;  %1745 = vmatmul.mubr.msk.f32.gmra.mrb[2].mxu1 %vm737_vm7, %v531_v50  ;;  %vm1859_vm1 = vmpackc.low %vm472_vm9, %vm468_vm8 }
  0x43   : > { %826 = vmatprep.mubr.f32.mxu0 %v2028_v9  ;;  %915 = vmatprep.mubr.f32.mxu1 %v2028_v9  ;;  %vm1849_vm4 = vmpackc.low %vm479_vm12, %vm475_vm11 }
  0x44   : > { %1848 = vmatpush1.bf16.msk.msra.mxu0 %vm1847_vm13, %v2029_v36  ;;  %1860 = vmatpush1.bf16.msk.msra.mxu1 %vm1859_vm1, %v2029_v36  ;;  %vm1861_vm6 = vmpackc.low %vm481_vm15, %vm477_vm14 }
  0x45   : > { %1850 = vmatprep.subr.msk.bf16.mxu0 %vm1849_vm4, %v2029_v36  ;;  %1862 = vmatprep.subr.msk.bf16.mxu1 %vm1861_vm6, %v2029_v36  ;;  %vm1851_vm8 = vmpackc.low %vm478_vm3, %vm474_vm2 }
  0x46   : > { %1726 = vmatmul.mubr.msk.f32.gmra.mrb[4].mxu0 %vm737_vm7, %v532_v51  ;;  %1746 = vmatmul.mubr.msk.f32.gmra.mrb[4].mxu1 %vm737_vm7, %v532_v51  ;;  %vm1863_vm9 = vmpackc.low %vm480_vm5, %vm476_vm0 }
  0x47   : > { %832 = vmatprep.mubr.f32.mxu0 %v2028_v9  ;;  %921 = vmatprep.mubr.f32.mxu1 %v2028_v9 }
  0x48   : > { %1852 = vmatpush1.bf16.msk.msra.mxu0 %vm1851_vm8, %v2029_v36  ;;  %1864 = vmatpush1.bf16.msk.msra.mxu1 %vm1863_vm9, %v2029_v36 }
  0x4a   : > { %1727 = vmatmul.mubr.msk.f32.gmra.mrb[6].mxu0 %vm737_vm7, %v533_v52  ;;  %1747 = vmatmul.mubr.msk.f32.gmra.mrb[6].mxu1 %vm737_vm7, %v533_v52 }
  0x4b   : > { %1109 = vmatprep.mubr.f32.mxu0 %v2028_v9  ;;  %1204 = vmatprep.mubr.f32.mxu1 %v2028_v9 }
  0x4e   : > { %1776 = vmatmul.mubr.msk.f32.vlgmr.msra.gmra.mrb[8].mxu0 %vm1029_vm10, %v1024_v53  ;;  %1793 = vmatmul.mubr.msk.f32.vlgmr.msra.gmra.mrb[8].mxu1 %vm1029_vm10, %v1024_v53 }
  0x4f   : > { %1115 = vmatprep.mubr.f32.mxu0 %v2028_v9  ;;  %1210 = vmatprep.mubr.f32.mxu1 %v2028_v9 }
  0x52   : > { %1777 = vmatmul.mubr.msk.f32.gmra.mrb[10].mxu0 %vm1029_vm10, %v1025_v54  ;;  %1794 = vmatmul.mubr.msk.f32.gmra.mrb[10].mxu1 %vm1029_vm10, %v1025_v54 }
  0x53   : > { %1121 = vmatprep.mubr.f32.mxu0 %v2028_v9  ;;  %1216 = vmatprep.mubr.f32.mxu1 %v2028_v9 }
  0x56   : > { %1778 = vmatmul.mubr.msk.f32.gmra.mrb[12].mxu0 %vm1029_vm10, %v1026_v55  ;;  %1795 = vmatmul.mubr.msk.f32.gmra.mrb[12].mxu1 %vm1029_vm10, %v1026_v55 }
  0x57   : > { %1127 = vmatprep.mubr.f32.mxu0 %v2028_v9  ;;  %1222 = vmatprep.mubr.f32.mxu1 %v2028_v9 }
  0x5a   : > { %1779 = vmatmul.mubr.msk.f32.gmra.mrb[14].mxu0 %vm1029_vm10, %v1027_v56  ;;  %1796 = vmatmul.mubr.msk.f32.gmra.mrb[14].mxu1 %vm1029_vm10, %v1027_v56 }
  0x5b   : > { %1133 = vmatprep.mubr.f32.mxu0 %v2028_v9  ;;  %1228 = vmatprep.mubr.f32.mxu1 %v2028_v9 }
  0x5e   : > { %1780 = vmatmul.mubr.msk.f32.gmra.mrb[16].mxu0 %vm1029_vm10, %v1028_v57  ;;  %1797 = vmatmul.mubr.msk.f32.gmra.mrb[16].mxu1 %vm1029_vm10, %v1028_v57 }
 0x111   : > { %v2463_v58 = vpop.f32.mrb[0].mxu0  ;;  %v2465_v59 = vpop.f32.mrb[0].mxu1 }
 0x112   : > { %v2467_v60 = vpop.f32.mrb[1].mxu0  ;;  %v2469_v61 = vpop.f32.mrb[1].mxu1  ;;  %v944_v2 = vmin.f32 %v2463_v58, 0.0  ;;  %v946_v3 = vmin.f32 %v2465_v59, 0.0  ;;  %vm928_vm7 = vcmp.gt.f32.partialorder %v2463_v58, 0.0  ;;  %vm930_vm11 = vcmp.gt.f32.partialorder %v2465_v59, 0.0 }
 0x113   : > { %v945_v5 = vmin.f32 %v2467_v60, 0.0  ;;  %v947_v9 = vmin.f32 %v2469_v61, 0.0  ;;  %vm929_vm12 = vcmp.gt.f32.partialorder %v2467_v60, 0.0  ;;  %vm931_vm13 = vcmp.gt.f32.partialorder %v2469_v61, 0.0 }
 0x114   : > { %v960_v12 = vmul.f32 1.442695, %v944_v2  ;;  %v964_v14 = vmul.f32 1.442695, %v946_v3 }
 0x115   : > { %v2471_v62 = vpop.f32.mrb[2].mxu0  ;;  %v2473_v63 = vpop.f32.mrb[2].mxu1  ;;  %v962_v17 = vmul.f32 1.442695, %v945_v5  ;;  %v966_v21 = vmul.f32 1.442695, %v947_v9 }
 0x116   : > { %v2475_v0 = vpop.f32.mrb[3].mxu0  ;;  %v2477_v1 = vpop.f32.mrb[3].mxu1  ;;  %v948_v13 = vmin.f32 %v2471_v62, 0.0  ;;  %v950_v15 = vmin.f32 %v2473_v63, 0.0  ;;  %1908 = vpow2.f32 %v960_v12  ;;  %vm932_vm14 = vcmp.gt.f32.partialorder %v2471_v62, 0.0 }
 0x117   : > { %v949_v18 = vmin.f32 %v2475_v0, 0.0  ;;  %v951_v22 = vmin.f32 %v2477_v1, 0.0  ;;  %1910 = vpow2.f32 %v964_v14  ;;  %vm934_vm15 = vcmp.gt.f32.partialorder %v2473_v63, 0.0 }
 0x118   : > { %v968_v24 = vmul.f32 1.442695, %v948_v13  ;;  %v972_v26 = vmul.f32 1.442695, %v950_v15  ;;  %1912 = vpow2.f32 %v962_v17  ;;  %vm933_vm1 = vcmp.gt.f32.partialorder %v2475_v0, 0.0 }
 0x119   : > { %v2481_v4 = vpop.f32.mrb[4].mxu0  ;;  %v2484_v6 = vpop.f32.mrb[4].mxu1  ;;  %v970_v28 = vmul.f32 1.442695, %v949_v18  ;;  %1914 = vpow2.f32 %v966_v21  ;;  %v974_v31 = vmul.f32 1.442695, %v951_v22 }
 0x11a   : > { %v2486_v7 = vpop.f32.mrb[5].mxu0  ;;  %v2489_v11 = vpop.f32.mrb[5].mxu1  ;;  %v952_v25 = vmin.f32 %v2481_v4, 0.0  ;;  %v954_v32 = vmin.f32 %v2484_v6, 0.0  ;;  %1916 = vpow2.f32 %v968_v24  ;;  %vm935_vm2 = vcmp.gt.f32.partialorder %v2477_v1, 0.0 }
 0x11b   : > { %2864 = vst [vmem:[#allocation4_spill] sm:$0xff] %v2486_v7  ;;  %2865 = vst [vmem:[#allocation5_spill] sm:$0xff] %v2489_v11  ;;  %1918 = vpow2.f32 %v972_v26  ;;  %v953_v35 = vmin.f32 %v2486_v7, 0.0  ;;  %v955_v38 = vmin.f32 %v2489_v11, 0.0 }
 0x11c   : > { %v976_v34 = vmul.f32 1.442695, %v952_v25  ;;  %1920 = vpow2.f32 %v970_v28  ;;  %v980_v42 = vmul.f32 1.442695, %v954_v32 }
 0x11d   : > { %v2493_v16 = vpop.f32.mrb[6].mxu0  ;;  %v2496_v19 = vpop.f32.mrb[6].mxu1  ;;  %1922 = vpow2.f32 %v974_v31  ;;  %v978_v47 = vmul.f32 1.442695, %v953_v35  ;;  %v982_v51 = vmul.f32 1.442695, %v955_v38 }
 0x11e   : > { %2866 = vst [vmem:[#allocation6_spill] sm:$0xff] %v2493_v16  ;;  %v2498_v20 = vpop.f32.mrb[7].mxu0  ;;  %v2501_v23 = vpop.f32.mrb[7].mxu1  ;;  %1924 = vpow2.f32 %v976_v34  ;;  %v956_v48 = vmin.f32 %v2493_v16, 0.0 }
 0x120   : > { %v1909_v50 = vpop.eup %1908  ;;  %v984_v12 = vmul.f32 1.442695, %v956_v48 }
 0x121   : > { %v2504_v27 = vpop.f32.mrb[8].mxu0  ;;  %v2506_v29 = vpop.f32.mrb[8].mxu1  ;;  %v1748_v9 = vadd.f32 -1.0, %v1909_v50 }
 0x122   : > { %v2508_v30 = vpop.f32.mrb[9].mxu0  ;;  %v2511_v33 = vpop.f32.mrb[9].mxu1  ;;  %v1251_v36 = vmin.f32 %v2504_v27, 20.0  ;;  %v1253_v39 = vmin.f32 %v2506_v29, 20.0  ;;  %vm1235_vm3 = vcmp.gt.f32.partialorder %v2504_v27, 20.0  ;;  %vm1237_vm0 = vcmp.gt.f32.partialorder %v2506_v29, 20.0 }
 0x123   : > { %v1252_v46 = vmin.f32 %v2508_v30, 20.0  ;;  %v1911_v55 = vpop.eup %1910  ;;  %v1254_v56 = vmin.f32 %v2511_v33, 20.0  ;;  %vm1236_vm6 = vcmp.gt.f32.partialorder %v2508_v30, 20.0  ;;  %vm1238_vm10 = vcmp.gt.f32.partialorder %v2511_v33, 20.0 }
 0x124   : > { %v1267_v43 = vmul.f32 1.442695, %v1251_v36  ;;  %v1271_v45 = vmul.f32 1.442695, %v1253_v39  ;;  %v1913_v2 = vpop.eup %1912  ;;  %v1750_v25 = vadd.f32 -1.0, %v1911_v55  ;;  %v2558_v39 = vsel %vm928_vm7, %v2463_v58, %v1748_v9 }
 0x125   : > { %v2515_v37 = vpop.f32.mrb[10].mxu0  ;;  %v2519_v40 = vpop.f32.mrb[10].mxu1  ;;  %v1269_v52 = vmul.f32 1.442695, %v1252_v46  ;;  %v1273_v13 = vmul.f32 1.442695, %v1254_v56 }
 0x126   : > { %v2521_v41 = vpop.f32.mrb[11].mxu0  ;;  %v2523_v44 = vpop.f32.mrb[11].mxu1  ;;  %1926 = vpow2.f32 %v1267_v43  ;;  %v1255_v3 = vmin.f32 %v2515_v37, 20.0  ;;  %v1257_v18 = vmin.f32 %v2519_v40, 20.0  ;;  %v1749_v26 = vadd.f32 -1.0, %v1913_v2 }
 0x127   : > { %1928 = vpow2.f32 %v1271_v45  ;;  %v1915_v5 = vpop.eup %1914  ;;  %v1256_v36 = vmin.f32 %v2521_v41, 20.0  ;;  %v1258_v43 = vmin.f32 %v2523_v44, 20.0  ;;  %v2572_v55 = vsel %vm930_vm11, %v2465_v59, %v1750_v25 }
 0x128   : > { %1930 = vpow2.f32 %v980_v42  ;;  %v1917_v15 = vpop.eup %1916  ;;  %v1275_v17 = vmul.f32 1.442695, %v1255_v3  ;;  %v1751_v34 = vadd.f32 -1.0, %v1915_v5  ;;  %v1279_v35 = vmul.f32 1.442695, %v1257_v18 }
 0x129   : > { %v2528_v49 = vpop.f32.mrb[12].mxu0  ;;  %v2530_v53 = vpop.f32.mrb[12].mxu1  ;;  %1932 = vpow2.f32 %v1269_v52  ;;  %v1752_v42 = vadd.f32 -1.0, %v1917_v15  ;;  %v1277_v48 = vmul.f32 1.442695, %v1256_v36  ;;  %v2577_v56 = vsel %vm929_vm12, %v2467_v60, %v1749_v26 }
 0x12a   : > { %2867 = vst [vmem:[#allocation7_spill] sm:$0xff] %v2530_v53  ;;  %v2532_v54 = vpop.f32.mrb[13].mxu0  ;;  %v2537_v57 = vpop.f32.mrb[13].mxu1  ;;  %1934 = vpow2.f32 %v978_v47  ;;  %v1259_v50 = vmin.f32 %v2528_v49, 20.0  ;;  %v1281_v3 = vmul.f32 1.442695, %v1258_v43 }
 0x12b   : > { %2868 = vst [vmem:[#allocation8_spill] sm:$0xff] %v2532_v54  ;;  %1936 = vpow2.f32 %v982_v51  ;;  %v1919_v24 = vpop.eup %1918  ;;  %v2591_v60 = vsel %vm932_vm14, %v2471_v62, %v1752_v42  ;;  %vm1239_vm11 = vcmp.gt.f32.partialorder %v2515_v37, 20.0 }
 0x12c   : > { %1938 = vpow2.f32 %v1273_v13  ;;  %v1921_v32 = vpop.eup %1920  ;;  %v1754_v47 = vadd.f32 -1.0, %v1919_v24  ;;  %v1283_v26 = vmul.f32 1.442695, %v1259_v50  ;;  %v1261_v50 = vmin.f32 %v2530_v53, 20.0 }
 0x12d   : > { %v2543_v14 = vpop.f32.mrb[14].mxu0  ;;  %v2547_v21 = vpop.f32.mrb[14].mxu1  ;;  %1940 = vpow2.f32 %v1275_v17  ;;  %v1753_v2 = vadd.f32 -1.0, %v1921_v32 }
 0x12e   : > { %v2549_v22 = vpop.f32.mrb[15].mxu0  ;;  %v2552_v31 = vpop.f32.mrb[15].mxu1  ;;  %1942 = vpow2.f32 %v984_v12  ;;  %v2584_v12 = vsel %vm931_vm13, %v2469_v61, %v1751_v34  ;;  %v2596_v25 = vsel %vm934_vm15, %v2473_v63, %v1754_v47  ;;  %vm1241_vm13 = vcmp.gt.f32.partialorder %v2519_v40, 20.0 }
 0x12f   : > { %v1923_v38 = vpop.eup %1922  ;;  %1944 = vpow2.f32 %v1279_v35  ;;  %v2603_v34 = vsel %vm933_vm1, %v2475_v0, %v1753_v2  ;;  %vm1240_vm15 = vcmp.gt.f32.partialorder %v2521_v41, 20.0  ;;  %vm1242_vm1 = vcmp.gt.f32.partialorder %v2523_v44, 20.0 }
 0x130   : > { %v1925_v46 = vpop.eup %1924  ;;  %1946 = vpow2.f32 %v1277_v48  ;;  %v1755_v61 = vadd.f32 -1.0, %v1923_v38 }
 0x131   : > { %v2561_v45 = vpop.f32.mrb[16].mxu0  ;;  %v2565_v51 = vpop.f32.mrb[16].mxu1  ;;  %1948 = vpow2.f32 %v1281_v3  ;;  %v2607_v38 = vadd.f32 -1.0, %v1925_v46 }
 0x132   : > { %2869 = vst [vmem:[#allocation9_spill] sm:$0xff] %v2561_v45  ;;  %2870 = vst [vmem:[#allocation10_spill] sm:$0xff] %v2565_v51  ;;  %v2567_v52 = vpop.f32.mrb[17].mxu0  ;;  %v1927_v58 = vpop.eup %1926 }
 0x133   : > { %2871 = vst [vmem:[#allocation11_spill] sm:$0xff] %v2567_v52  ;;  %v2579_v5 = vpop.f32.mrb[17].mxu1  ;;  %v1929_v9 = vpop.eup %1928  ;;  %v1299_v13 = vadd.f32 1.0, %v1927_v58  ;;  %v1302_v15 = vmul.f32 -0.5, %v1927_v58  ;;  %v1305_v62 = vand.u32 2147483647, %v1927_v58 }
 0x134   : > { %2872 = vst [vmem:[#allocation12_spill] sm:$0xff] %v2579_v5  ;;  %v2586_v59 = vpop.eup %1930  ;;  %v1317_v17 = vadd.f32 1.0, %v1929_v9  ;;  %v1320_v18 = vmul.f32 -0.5, %v1929_v9  ;;  %v1323_v43 = vand.u32 2147483647, %v1929_v9 }
 0x135   : > { %v1933_v24 = vpop.eup %1932  ;;  %1950 = vlog2.f32 %v1299_v13  ;;  %v1303_v42 = vadd.f32 1.0, %v1302_v15  ;;  %v2615_v15 = vsel %vm935_vm2, %v2477_v1, %v1755_v61  ;;  %vm2618_vm4 = vcmp.lt.f32.partialorder %v1305_v62, 0.0004427343 }
 0x136   : > { %v2598_v32 = vpop.eup %1934  ;;  %1952 = vlog2.f32 %v1317_v17  ;;  %v1308_v35 = vadd.f32 1.0, %v1933_v24  ;;  %v1311_v48 = vmul.f32 -0.5, %v1933_v24  ;;  %v1321_v47 = vadd.f32 1.0, %v1320_v18 }
 0x137   : > { %v2605_v36 = vpop.eup %1936  ;;  %1954 = vpow2.f32 %v1283_v26  ;;  %v1314_v0 = vand.u32 2147483647, %v1933_v24  ;;  %vm2625_vm5 = vcmp.lt.f32.partialorder %v1323_v43, 0.0004427343  ;;  %v1287_v62 = vmul.f32 1.442695, %v1261_v50 }
 0x138   : > { %2873 = vst [vmem:[#allocation13_spill] sm:$0xff] %v2605_v36  ;;  %v1939_v63 = vpop.eup %1938  ;;  %1956 = vlog2.f32 %v1308_v35  ;;  %v1312_v13 = vadd.f32 1.0, %v1311_v48  ;;  %v1304_v48 = vmul.f32 %v1927_v58, %v1303_v42  ;;  %v1322_v61 = vmul.f32 %v1929_v9, %v1321_v47 }
 0x139   : > { %v1941_v3 = vpop.eup %1940  ;;  %v1326_v2 = vadd.f32 1.0, %v1939_v63  ;;  %v1329_v8 = vmul.f32 -0.5, %v1939_v63  ;;  %v1332_v1 = vand.u32 2147483647, %v1939_v63  ;;  %vm2630_vm8 = vcmp.lt.f32.partialorder %v1314_v0, 0.0004427343 }
 0x13a   : > { %v2610_v17 = vpop.eup %1942  ;;  %v1335_v18 = vadd.f32 1.0, %v1941_v3  ;;  %v1338_v26 = vmul.f32 -0.5, %v1941_v3  ;;  %v1341_v5 = vand.u32 2147483647, %v1941_v3  ;;  %v1313_v52 = vmul.f32 %v1933_v24, %v1312_v13 }
 0x13b   : > { %2874 = vst [vmem:[#allocation14_spill] sm:$0xff] %v2610_v17  ;;  %v2622_v35 = vpop.eup %1944  ;;  %1958 = vlog2.f32 %v1326_v2  ;;  %v1330_v58 = vadd.f32 1.0, %v1329_v8  ;;  %v1260_v47 = vmin.f32 %v2532_v54, 20.0  ;;  %vm2639_vm9 = vcmp.lt.f32.partialorder %v1332_v1, 0.0004427343 }
 0x13c   : > { %1960 = vlog2.f32 %v1335_v18  ;;  %v1947_v10 = vpop.eup %1946  ;;  %v1353_v42 = vadd.f32 1.0, %v2622_v35  ;;  %v1339_v45 = vadd.f32 1.0, %v1338_v26  ;;  %v1356_v2 = vmul.f32 -0.5, %v2622_v35 }
 0x13d   : > { %v2635_v43 = vpop.eup %1948  ;;  %v1344_v9 = vadd.f32 1.0, %v1947_v10  ;;  %v1359_v24 = vand.u32 2147483647, %v2622_v35  ;;  %v1347_v13 = vmul.f32 -0.5, %v1947_v10  ;;  %vm2646_vm7 = vcmp.lt.f32.partialorder %v1341_v5, 0.0004427343 }
 0x13e   : > { %1962 = vlog2.f32 %v1353_v42  ;;  %v1362_v8 = vadd.f32 1.0, %v2635_v43  ;;  %v1350_v54 = vand.u32 2147483647, %v1947_v10  ;;  %v1331_v17 = vmul.f32 %v1939_v63, %v1330_v58 }
 0x13f   : > { %v1951_v50 = vpop.eup %1950  ;;  %1964 = vlog2.f32 %v1344_v9  ;;  %v1365_v42 = vmul.f32 -0.5, %v2635_v43  ;;  %v1340_v11 = vmul.f32 %v1941_v3, %v1339_v45  ;;  %v1357_v5 = vadd.f32 1.0, %v1356_v2 }
 0x140   : > { %v1953_v0 = vpop.eup %1952  ;;  %v1301_v16 = vmul.f32 0.6931472, %v1951_v50  ;;  %1966 = vlog2.f32 %v1362_v8  ;;  %vm2662_vm12 = vcmp.lt.f32.partialorder %v1359_v24, 0.0004427343  ;;  %vm2671_vm14 = vcmp.lt.f32.partialorder %v1350_v54, 0.0004427343 }
 0x141   : > { %v2650_v1 = vpop.eup %1954  ;;  %v1319_v53 = vmul.f32 0.6931472, %v1953_v0  ;;  %v1348_v0 = vadd.f32 1.0, %v1347_v13 }
 0x142   : > { %v1957_v36 = vpop.eup %1956  ;;  %v1307_v50 = vsel %vm2618_vm4, %v1304_v48, %v1301_v16  ;;  %v1371_v7 = vadd.f32 1.0, %v2650_v1 }
 0x143   : > { %v1443_v9 = vsel %vm1235_vm3, %v2504_v27, %v1307_v50  ;;  %v1325_v63 = vsel %vm2625_vm5, %v1322_v61, %v1319_v53  ;;  %v1310_v58 = vmul.f32 0.6931472, %v1957_v36  ;;  %v1368_v27 = vand.u32 2147483647, %v2635_v43 }
 0x144   : > { %v1459_v46 = vmul.f32 %v1443_v9, %v2558_v39  ;;  %v1445_v16 = vsel %vm1237_vm0, %v2506_v29, %v1325_v63  ;;  %1968 = vlog2.f32 %v1371_v7  ;;  %v1366_v39 = vadd.f32 1.0, %v1365_v42 }
 0x145   : > { %v1959_v53 = vpop.eup %1958  ;;  %v1461_v28 = vmul.f32 %v1445_v16, %v2572_v55  ;;  %v1316_v36 = vsel %vm2630_vm8, %v1313_v52, %v1310_v58  ;;  %v1374_v29 = vmul.f32 -0.5, %v2650_v1  ;;  %v1358_v61 = vmul.f32 %v2622_v35, %v1357_v5 }
 0x146   : > { %v1961_v3 = vpop.eup %1960  ;;  %v1444_v54 = vsel %vm1236_vm6, %v2508_v30, %v1316_v36  ;;  %v1328_v48 = vmul.f32 0.6931472, %v1959_v53  ;;  %1970 = vpow2.f32 %v1287_v62  ;;  %v1349_v52 = vmul.f32 %v1947_v10, %v1348_v0 }
 0x147   : > { %v1460_v7 = vmul.f32 %v1444_v54, %v2577_v56  ;;  %v1337_v51 = vmul.f32 0.6931472, %v1961_v3  ;;  %v1285_v55 = vmul.f32 1.442695, %v1260_v47  ;;  %vm2689_vm2 = vcmp.lt.f32.partialorder %v1368_v27, 0.0004427343 }
 0x148   : > { %v1334_v2 = vsel %vm2639_vm9, %v1331_v17, %v1328_v48  ;;  %v1375_v13 = vadd.f32 1.0, %v1374_v29  ;;  %v1262_v30 = vmin.f32 %v2537_v57, 20.0  ;;  %v1963_v42 = vpop.eup %1962  ;;  %vm936_vm3 = vcmp.gt.f32.partialorder %v2481_v4, 0.0 }
 0x149   : > { %v1446_v56 = vsel %vm1238_vm10, %v2511_v33, %v1334_v2  ;;  %v1343_v10 = vsel %vm2646_vm7, %v1340_v11, %v1337_v51  ;;  %v1367_v35 = vmul.f32 %v2635_v43, %v1366_v39  ;;  %1972 = vpow2.f32 %v1285_v55  ;;  %v1965_v17 = vpop.eup %1964 }
 0x14a   : > { %v1462_v62 = vmul.f32 %v1446_v56, %v2584_v12  ;;  %v1447_v47 = vsel %vm1239_vm11, %v2515_v37, %v1343_v10  ;;  %v1355_v18 = vmul.f32 0.6931472, %v1963_v42  ;;  %v1289_v50 = vmul.f32 1.442695, %v1262_v30  ;;  %v1967_v5 = vpop.eup %1966 }
 0x14b   : > { %v1463_v9 = vmul.f32 %v1447_v47, %v2591_v60  ;;  %v1346_v63 = vmul.f32 0.6931472, %v1965_v17  ;;  %v1377_v33 = vand.u32 2147483647, %v2650_v1  ;;  %v1263_v11 = vmin.f32 %v2543_v14, 20.0 }
 0x14c   : > { %v1361_v43 = vsel %vm2662_vm12, %v1358_v61, %v1355_v18  ;;  %v1364_v26 = vmul.f32 0.6931472, %v1967_v5  ;;  %v1376_v12 = vmul.f32 %v2650_v1, %v1375_v13  ;;  %1974 = vpow2.f32 %v1289_v50  ;;  %v2892_v5 = vld [vmem:[#allocation4_spill] sm:$0xff] }
 0x14d   : > { %v1475_v58 = vadd.f32 %v1463_v9, %v1459_v46  ;;  %v1449_v37 = vsel %vm1241_vm13, %v2519_v40, %v1361_v43  ;;  %v1352_v60 = vsel %vm2671_vm14, %v1349_v52, %v1346_v63  ;;  %v1291_v0 = vmul.f32 1.442695, %v1263_v11  ;;  %v2893_v11 = vld [vmem:[#allocation5_spill] sm:$0xff] }
 0x14e   : > { %v1969_v16 = vpop.eup %1968  ;;  %v1465_v27 = vmul.f32 %v1449_v37, %v2596_v25  ;;  %v1448_v8 = vsel %vm1240_vm15, %v2521_v41, %v1352_v60  ;;  %v1370_v1 = vsel %vm2689_vm2, %v1367_v35, %v1364_v26  ;;  %v1265_v46 = vmin.f32 %v2547_v21, 20.0 }
 0x14f   : > { %v1464_v53 = vmul.f32 %v1448_v8, %v2603_v34  ;;  %v1450_v40 = vsel %vm1242_vm1, %v2523_v44, %v1370_v1  ;;  %v1373_v45 = vmul.f32 0.6931472, %v1969_v16  ;;  %1976 = vpow2.f32 %v1291_v0  ;;  %v2895_v8 = vld [vmem:[#allocation14_spill] sm:$0xff] }
 0x150   : > { %v1971_v36 = vpop.eup %1970  ;;  %v2727_v39 = vadd.f32 %v1465_v27, %v1461_v28  ;;  %v1466_v25 = vmul.f32 %v1450_v40, %v2615_v15  ;;  %vm1378_vm4 = vcmp.lt.f32.partialorder %v1377_v33, 0.0004427343  ;;  %v1295_v41 = vmul.f32 1.442695, %v1265_v46  ;;  %v2896_v40 = vld [vmem:[#allocation7_spill] sm:$0xff] }
 0x151   : > { %v2730_v29 = vadd.f32 %v1464_v53, %v1460_v7  ;;  %vm1243_vm0 = vcmp.gt.f32.partialorder %v2528_v49, 20.0  ;;  %v1379_v3 = vsel %vm1378_vm4, %v1376_v12, %v1373_v45  ;;  %v1389_v54 = vadd.f32 1.0, %v1971_v36 }
 0x152   : > { %v1016_v44 = vsel %vm936_vm3, %v2481_v4, %v2607_v38  ;;  %v2737_v34 = vadd.f32 %v1466_v25, %v1462_v62  ;;  %v1451_v28 = vsel %vm1243_vm0, %v2528_v49, %v1379_v3  ;;  %1978 = vpow2.f32 %v1295_v41 }
 0x153   : > { %v1973_v48 = vpop.eup %1972  ;;  %v957_v15 = vmin.f32 %v2498_v20, 0.0  ;;  %v1467_v61 = vmul.f32 %v1451_v28, %v1016_v44  ;;  %1980 = vlog2.f32 %v1389_v54  ;;  %v1264_v7 = vmin.f32 %v2549_v22, 20.0 }
 0x154   : > { %v2891_v51 = vmin.f32 %v2496_v19, 0.0  ;;  %v1380_v55 = vadd.f32 1.0, %v1973_v48  ;;  %v959_v2 = vmin.f32 %v2501_v23, 0.0  ;;  %v1392_v49 = vmul.f32 -0.5, %v1971_v36 }
 0x155   : > { %v2745_v24 = vadd.f32 %v1475_v58, %v1467_v61  ;;  %v1293_v4 = vmul.f32 1.442695, %v1264_v7  ;;  %v1266_v13 = vmin.f32 %v2552_v31, 20.0  ;;  %v986_v30 = vmul.f32 1.442695, %v957_v15 }
 0x156   : > { %v988_v52 = vmul.f32 1.442695, %v2891_v51  ;;  %v2747_v38 = vpop.eup %1974  ;;  %1982 = vlog2.f32 %v1380_v55  ;;  %vm938_vm5 = vcmp.gt.f32.partialorder %v2484_v6, 0.0  ;;  %v1758_v35 = vadd.f32 -1.0, %v2586_v59  ;;  %v2894_v59 = vld [vmem:[#allocation13_spill] sm:$0xff]  ;;  %v2899_v55 = vld [vmem:[#allocation8_spill] sm:$0xff] }
 0x157   : > { %v1398_v42 = vadd.f32 1.0, %v2747_v38  ;;  %1984 = vpow2.f32 %v1293_v4  ;;  %v1297_v56 = vmul.f32 1.442695, %v1266_v13  ;;  %v990_v17 = vmul.f32 1.442695, %v959_v2 }
 0x158   : > { %1986 = vpow2.f32 %v988_v52  ;;  %v1383_v62 = vmul.f32 -0.5, %v1973_v48  ;;  %v1757_v47 = vadd.f32 -1.0, %v2598_v32  ;;  %v1393_v18 = vadd.f32 1.0, %v1392_v49 }
 0x159   : > { %v2752_v10 = vpop.eup %1976  ;;  %1988 = vlog2.f32 %v1398_v42  ;;  %vm937_vm6 = vcmp.gt.f32.partialorder %v2892_v5, 0.0  ;;  %v1395_v9 = vand.u32 2147483647, %v1971_v36  ;;  %v1401_v63 = vmul.f32 -0.5, %v2747_v38 }
 0x15a   : > { %v1407_v50 = vadd.f32 1.0, %v2752_v10  ;;  %1990 = vpow2.f32 %v1297_v56  ;;  %vm939_vm8 = vcmp.gt.f32.partialorder %v2893_v11, 0.0  ;;  %v1759_v43 = vadd.f32 -1.0, %v2894_v59  ;;  %v2900_v59 = vld [vmem:[#allocation6_spill] sm:$0xff] }
 0x15b   : > { %1992 = vpow2.f32 %v986_v30  ;;  %v1386_v26 = vand.u32 2147483647, %v1973_v48  ;;  %v1018_v32 = vsel %vm938_vm5, %v2484_v6, %v1758_v35  ;;  %v1384_v58 = vadd.f32 1.0, %v1383_v62 }
 0x15c   : > { %v2759_v33 = vpop.eup %1978  ;;  %1994 = vlog2.f32 %v1407_v50  ;;  %v1017_v60 = vsel %vm937_vm6, %v2892_v5, %v1757_v47  ;;  %v1394_v16 = vmul.f32 %v1971_v36, %v1393_v18  ;;  %v1410_v27 = vmul.f32 -0.5, %v2752_v10 }
 0x15d   : > { %v1981_v12 = vpop.eup %1980  ;;  %1996 = vpow2.f32 %v990_v17  ;;  %v1425_v37 = vadd.f32 1.0, %v2759_v33  ;;  %v1760_v1 = vadd.f32 -1.0, %v2895_v8  ;;  %vm1396_vm9 = vcmp.lt.f32.partialorder %v1395_v9, 0.0004427343 }
 0x15e   : > { %v1391_v0 = vmul.f32 0.6931472, %v1981_v12  ;;  %v1402_v46 = vadd.f32 1.0, %v1401_v63  ;;  %v1019_v6 = vsel %vm939_vm8, %v2893_v11, %v1759_v43  ;;  %vm1245_vm10 = vcmp.gt.f32.partialorder %v2896_v40, 20.0 }
 0x15f   : > { %1998 = vlog2.f32 %v1425_v37  ;;  %vm2774_vm7 = vcmp.lt.f32.partialorder %v1386_v26, 0.0004427343  ;;  %v1385_v54 = vmul.f32 %v1973_v48, %v1384_v58  ;;  %v1404_v44 = vand.u32 2147483647, %v2747_v38 }
 0x160   : > { %v1983_v53 = vpop.eup %1982  ;;  %v1397_v45 = vsel %vm1396_vm9, %v1394_v16, %v1391_v0  ;;  %v1411_v61 = vadd.f32 1.0, %v1410_v27  ;;  %v1428_v7 = vmul.f32 -0.5, %v2759_v33  ;;  %vm1244_vm11 = vcmp.gt.f32.partialorder %v2899_v55, 20.0 }
 0x161   : > { %v2778_v36 = vpop.eup %1984  ;;  %v1453_v41 = vsel %vm1245_vm10, %v2896_v40, %v1397_v45  ;;  %v1382_v3 = vmul.f32 0.6931472, %v1983_v53  ;;  %v1403_v4 = vmul.f32 %v2747_v38, %v1402_v46  ;;  %v1413_v49 = vand.u32 2147483647, %v2752_v10 }
 0x162   : > { %v1987_v28 = vpop.eup %1986  ;;  %v1469_v15 = vmul.f32 %v1453_v41, %v1018_v32  ;;  %v1416_v51 = vadd.f32 1.0, %v2778_v36  ;;  %vm1246_vm12 = vcmp.gt.f32.partialorder %v2537_v57, 20.0  ;;  %vm1405_vm13 = vcmp.lt.f32.partialorder %v1404_v44, 0.0004427343 }
 0x163   : > { %v1989_v52 = vpop.eup %1988  ;;  %v1388_v2 = vsel %vm2774_vm7, %v1385_v54, %v1382_v3  ;;  %v1412_v38 = vmul.f32 %v2752_v10, %v1411_v61  ;;  %v1429_v18 = vadd.f32 1.0, %v1428_v7  ;;  %v1431_v50 = vand.u32 2147483647, %v2759_v33 }
 0x164   : > { %v2789_v48 = vpop.eup %1990  ;;  %v1494_v13 = vadd.f32 %v2727_v39, %v1469_v15  ;;  %v1452_v30 = vsel %vm1244_vm11, %v2899_v55, %v1388_v2  ;;  %v1400_v42 = vmul.f32 0.6931472, %v1989_v52  ;;  %2000 = vlog2.f32 %v1416_v51 }
 0x165   : > { %v1993_v56 = vpop.eup %1992  ;;  %v1468_v35 = vmul.f32 %v1452_v30, %v1017_v60  ;;  %v1434_v17 = vadd.f32 1.0, %v2789_v48  ;;  %v1419_v11 = vmul.f32 -0.5, %v2778_v36  ;;  %vm940_vm14 = vcmp.gt.f32.partialorder %v2900_v59, 0.0 }
 0x166   : > { %v1995_v62 = vpop.eup %1994  ;;  %v1406_v47 = vsel %vm1405_vm13, %v1403_v4, %v1400_v42  ;;  %vm1414_vm15 = vcmp.lt.f32.partialorder %v1413_v49, 0.0004427343  ;;  %v1020_v12 = vsel %vm940_vm14, %v2900_v59, %v1760_v1  ;;  %v1762_v10 = vadd.f32 -1.0, %v1987_v28 }
 0x167   : > { %v1997_v5 = vpop.eup %1996  ;;  %v1485_v39 = vadd.f32 %v2730_v29, %v1468_v35  ;;  %v1454_v9 = vsel %vm1246_vm12, %v2537_v57, %v1406_v47  ;;  %v1409_v63 = vmul.f32 0.6931472, %v1995_v62  ;;  %2002 = vlog2.f32 %v1434_v17  ;;  %v2901_v47 = vld [vmem:[#allocation9_spill] sm:$0xff] }
 0x168   : > { %v1470_v43 = vmul.f32 %v1454_v9, %v1019_v6  ;;  %vm1247_vm1 = vcmp.gt.f32.partialorder %v2543_v14, 20.0  ;;  %v1430_v37 = vmul.f32 %v2759_v33, %v1429_v18  ;;  %vm1432_vm2 = vcmp.lt.f32.partialorder %v1431_v50, 0.0004427343 }
 0x169   : > { %v1999_v26 = vpop.eup %1998  ;;  %v1415_v32 = vsel %vm1414_vm15, %v1412_v38, %v1409_v63  ;;  %v1420_v0 = vadd.f32 1.0, %v1419_v11  ;;  %v1437_v16 = vmul.f32 -0.5, %v2789_v48  ;;  %vm942_vm3 = vcmp.gt.f32.partialorder %v2496_v19, 0.0  ;;  %v2902_v11 = vld [vmem:[#allocation10_spill] sm:$0xff] }
 0x16a   : > { %v1503_v58 = vadd.f32 %v2737_v34, %v1470_v43  ;;  %v1455_v29 = vsel %vm1247_vm1, %v2543_v14, %v1415_v32  ;;  %v1427_v57 = vmul.f32 0.6931472, %v1999_v26  ;;  %vm1249_vm4 = vcmp.gt.f32.partialorder %v2547_v21, 20.0  ;;  %v2903_v32 = vld [vmem:[#allocation11_spill] sm:$0xff] }
 0x16b   : > { %v1471_v60 = vmul.f32 %v1455_v29, %v1020_v12  ;;  %v1422_v8 = vand.u32 2147483647, %v2778_v36  ;;  %v1022_v1 = vsel %vm942_vm3, %v2496_v19, %v1762_v10  ;;  %v1761_v33 = vadd.f32 -1.0, %v1993_v56 }
 0x16c   : > { %v1433_v27 = vsel %vm1432_vm2, %v1430_v37, %v1427_v57  ;;  %v1421_v40 = vmul.f32 %v2778_v36, %v1420_v0  ;;  %v1438_v45 = vadd.f32 1.0, %v1437_v16  ;;  %v1440_v3 = vand.u32 2147483647, %v2789_v48  ;;  %v2904_v37 = vld [vmem:[#allocation3_spill] sm:$0xff]  ;;  %v2905_v16 = vld [vmem:[#allocation12_spill] sm:$0xff] }
 0x16d   : > { %v1477_v34 = vadd.f32 %v2745_v24, %v1471_v60  ;;  %v1457_v14 = vsel %vm1249_vm4, %v2547_v21, %v1433_v27  ;;  %vm1423_vm0 = vcmp.lt.f32.partialorder %v1422_v8, 0.0004427343  ;;  %vm941_vm5 = vcmp.gt.f32.partialorder %v2498_v20, 0.0 }
 0x16e   : > { %v2001_v46 = vpop.eup %2000  ;;  %v1473_v53 = vmul.f32 %v1457_v14, %v1022_v1  ;;  %vm1248_vm6 = vcmp.gt.f32.partialorder %v2549_v22, 20.0  ;;  %v1021_v21 = vsel %vm941_vm5, %v2498_v20, %v1761_v33  ;;  %v1763_v44 = vadd.f32 -1.0, %v1997_v5 }
 0x16f   : > { %v1418_v6 = vmul.f32 0.6931472, %v2001_v46  ;;  %v1478_v25 = vrot.slane %v1477_v34, 4  ;;  %v1439_v7 = vmul.f32 %v2789_v48, %v1438_v45  ;;  %vm943_vm8 = vcmp.gt.f32.partialorder %v2501_v23, 0.0 }
 0x170   : > { %v1495_v41 = vadd.f32 %v1494_v13, %v1473_v53  ;;  %vm1441_vm9 = vcmp.lt.f32.partialorder %v1440_v3, 0.0004427343  ;;  %vm1250_vm10 = vcmp.gt.f32.partialorder %v2552_v31, 20.0  ;;  %v1023_v20 = vsel %vm943_vm8, %v2501_v23, %v1763_v44 }
 0x171   : > { %v1424_v19 = vsel %vm1423_vm0, %v1421_v40, %v1418_v6  ;;  %v1479_v24 = vadd.f32 %v1478_v25, %v1477_v34  ;;  %v2003_v54 = vpop.eup %2002  ;;  %v2030_v9 = vmov 1966171168   ;;  %v2906_v46 = vlaneseq }
 0x172   : > { %v1456_v28 = vsel %vm1248_vm6, %v2549_v22, %v1424_v19  ;;  %v1496_v15 = vrot.slane %v1495_v41, 4  ;;  %v1436_v61 = vmul.f32 0.6931472, %v2003_v54  ;;  %v1522_v63 = vunpack.c.l.s4 %v2030_v9 }
 0x173   : > { %v1472_v36 = vmul.f32 %v1456_v28, %v1021_v21  ;;  %v1480_v51 = vrot.slane %v1479_v24, 2  ;;  %vm1546_vm7 = vcmp.lt.s32.totalorder %v2906_v46, 512 }
 0x174   : > { %v1497_v52 = vadd.f32 %v1496_v15, %v1495_v41  ;;  %v1442_v2 = vsel %vm1441_vm9, %v1439_v7, %v1436_v61  ;;  %v1523_v12 = vunpack.c.0.s8 %v1522_v63 }
 0x175   : > { %v1486_v55 = vadd.f32 %v1485_v39, %v1472_v36  ;;  %v1481_v4 = vadd.f32 %v1480_v51, %v1479_v24  ;;  %v1458_v49 = vsel %vm1250_vm10, %v2552_v31, %v1442_v2 }
 0x176   : > { %v1498_v22 = vrot.slane %v1497_v52, 2  ;;  %v1474_v13 = vmul.f32 %v1458_v49, %v1023_v20  ;;  %v1526_v60 = vsub.s32 %v1523_v12, %v2904_v37 }
 0x177   : > { %v1482_v30 = vrot.slane %v1481_v4, 1  ;;  %v1487_v42 = vrot.slane %v1486_v55, 4 }
 0x178   : > { %v1499_v56 = vadd.f32 %v1498_v22, %v1497_v52  ;;  %v1504_v48 = vadd.f32 %v1503_v58, %v1474_v13 }
 0x179   : > { %v1483_v35 = vadd.f32 %v1482_v30, %v1481_v4  ;;  %v1488_v17 = vadd.f32 %v1487_v42, %v1486_v55 }
 0x17a   : > { %v1500_v62 = vrot.slane %v1499_v56, 1  ;;  %v1505_v50 = vrot.slane %v1504_v48, 4 }
 0x17b   : > { %v1511_v38 = vadd.f32 %v1483_v35, %v2901_v47  ;;  %v1489_v18 = vrot.slane %v1488_v17, 2 }
 0x17c   : > { %v1501_v5 = vadd.f32 %v1500_v62, %v1499_v56  ;;  %v1506_v23 = vadd.f32 %v1505_v50, %v1504_v48 }
 0x17d   : > { %v1490_v39 = vadd.f32 %v1489_v18, %v1488_v17 }
 0x17e   : > { %v1513_v31 = vadd.f32 %v1501_v5, %v2902_v11  ;;  %v1507_v43 = vrot.slane %v1506_v23, 2 }
 0x17f   : > { %v1491_v59 = vrot.slane %v1490_v39, 1 }
 0x180   : > { %v1508_v10 = vadd.f32 %v1507_v43, %v1506_v23 }
 0x181   : > { %v1492_v26 = vadd.f32 %v1491_v59, %v1490_v39 }
 0x182   : > { %v1509_v29 = vrot.slane %v1508_v10, 1 }
 0x183   : > { %v1512_v58 = vadd.f32 %v1492_v26, %v2903_v32 }
 0x184   : > { %v1510_v0 = vadd.f32 %v1509_v29, %v1508_v10 }
 0x185   : > { %v1519_v57 = vcombine.low %v1511_v38, %v1512_v58 }
 0x186   : > { %v1514_v27 = vadd.f32 %v1510_v0, %v2905_v16 }
 0x187   : > { %v1527_v8 = vrot.slane %v1519_v57, %v1526_v60 }
 0x188   : > { %v1520_v1 = vcombine.low %v1513_v31, %v1514_v27 }
 0x18a   : > { %v1534_v34 = vrot.slane %v1520_v1, %v1526_v60 }
 0x18c   : > { %v1535_v14 = vcombine.low %v1527_v8, %v1534_v34 }
 0x18e   : > { %v1542_v33 = vrot.slane %v1535_v14, %v1526_v60 }
 0x190   : > { %1548 = vst.msk [vmem:[%s318_s9] sm:$0xf] %vm1546_vm7, %v1542_v33 }
 0x191 PF: > { %p13_p9 = scmp.ge.s32.totalorder %s2083_s25, 4   ;;  %s2907_s21 = smov %s2022_s22 }
 0x192   : > { %s2908_s22 = smov %s2092_s28  ;;  %s2909_s23 = smov %s2083_s25 }
 0x193   :  { %15 = sbr.rel (!%p13_p9) target bundleno = 2 (0x2), region = 108 }

</bundles_post_ra>
